<compile_context>
chip_gen: v7x
topology: tpu7x:2x2x1
jax: 0.10.0
libtpu: 0.0.40
codegen_flags: <defaults>
</compile_context>

<pallas_src>
import jax
import jax.numpy as jnp
from jax import lax
from jax.experimental import pallas as pl
from jax.experimental.pallas import tpu as pltpu

LANES = 128
SUBLANES = 8


def _make_kernel(tr, tiles_per_core, rows_p, rows_q, grid_rows):
    """Build the kernel with shape / masking parameters baked in as constants."""
    mask_p = grid_rows > rows_p   # some logical rows of p are past its end
    mask_q = grid_rows > rows_q

    def kernel(p_ref, q_ref, out_ref, acc_p_ref, acc_q_ref):
        c = pl.program_id(0)   # core-split axis ("parallel")
        i = pl.program_id(1)   # reduction axis  ("arbitrary")

        @pl.when(i == 0)
        def _init():
            acc_p_ref[...] = jnp.zeros_like(acc_p_ref)
            acc_q_ref[...] = jnp.zeros_like(acc_q_ref)

        p = p_ref[...].astype(jnp.float32)
        q = q_ref[...].astype(jnp.float32)

        # Mask rows past each input's end to the log-neutral value *before*
        # the log (log(1)=0, log(1-0)=0), so OOB-garbage never contributes.
        if mask_p or mask_q:
            row0 = (c * tiles_per_core + i) * tr          # logical first row
            row_ids = lax.broadcasted_iota(jnp.int32, (tr, LANES), 0)
        if mask_p:
            p = jnp.where(row_ids < rows_p - row0, p, 1.0)
        if mask_q:
            q = jnp.where(row_ids < rows_q - row0, q, 0.0)

        # Steady state: EUP log + VPU adds, reduced to one (8,128) vreg per
        # quantity per step -> minimal accumulator vst/vld traffic.
        # NOTE: jnp.log(1 - q) intentionally matches torch.log(1 - q).
        acc_p_ref[...] += (
            jnp.log(p).reshape(tr // SUBLANES, SUBLANES, LANES).sum(axis=0))
        acc_q_ref[...] += (
            jnp.log(1.0 - q).reshape(tr // SUBLANES, SUBLANES, LANES).sum(axis=0))

        @pl.when(i == pl.num_programs(1) - 1)
        def _finalize():
            out_ref[0, 0, :, :] = acc_p_ref[...]
            out_ref[0, 1, :, :] = acc_q_ref[...]

    return kernel


def _canonicalize(x):
    x = jnp.asarray(x)
    if x.dtype not in (jnp.float32, jnp.bfloat16):
        x = x.astype(jnp.float32)
    return x


def _to_rows(x, neutral):
    """Flatten to (rows, 128). Multiples of 128 reshape for free (no HBM copy);
    otherwise only the sub-128 tail is padded with a log-neutral value."""
    flat = x.reshape(-1)
    n = flat.shape[0]
    rem = n % LANES
    if rem:
        # TODO(synk): a fully copy-free path for non-multiple-of-128 sizes
        # would need 1-D blocks or manual DMA; this pads < 128 elements.
        flat = jnp.concatenate(
            [flat, jnp.full((LANES - rem,), neutral, dtype=flat.dtype)])
    rows = flat.shape[0] // LANES
    return flat.reshape(rows, LANES), rows


def _sublane_multiple(dtype):
    # f32 -> 8 sublanes per tile, bf16 -> 16, (int8/fp8 would be 32).
    return SUBLANES * max(1, 4 // jnp.dtype(dtype).itemsize)


def _default_core_split():
    """2 only on chips with 2 TensorCores per device (v4 / v5p / v7x)."""
    try:
        kind = jax.devices()[0].device_kind.lower()
    except Exception:
        return 1
    if "lite" in kind or "v5e" in kind or "v6" in kind:
        return 1
    if "v4" in kind or "v5p" in kind or "v7" in kind or "v5" in kind:
        return 2
    return 1


def q1_4_loss(p, q, *, tile_rows=8192, core_split=None, min_pallas_elems=1 << 20):
    """-(mean(log p) + mean(log(1-q))) as a pipelined Pallas TPU reduction."""
    p = _canonicalize(p)
    q = _canonicalize(q)
    n_p = int(p.size)
    n_q = int(q.size)

    # Small-n bypass: Pallas launch + grid overhead dominates tiny inputs.
    if n_p + n_q < int(min_pallas_elems):
        return -(jnp.mean(jnp.log(p.astype(jnp.float32)))
                 + jnp.mean(jnp.log(1.0 - q.astype(jnp.float32))))

    p2, rows_p = _to_rows(p, 1.0)   # log(1)   = 0
    q2, rows_q = _to_rows(q, 0.0)   # log(1-0) = 0
    rows = max(rows_p, rows_q)

    if core_split is None:
        core_split = _default_core_split()
    core_split = max(1, int(core_split))

    # Tile geometry: sublane-aligned for the streamed dtypes, no bigger than
    # each core's share of rows, and capped so 2 inputs x 2 pipeline buffers
    # (+ f32 temporaries) stay well inside v7x's 64 MiB per-core VMEM.
    mult = max(_sublane_multiple(p2.dtype), _sublane_multiple(q2.dtype))
    tr = min(int(tile_rows), pl.cdiv(rows, core_split))
    tr = max(pl.cdiv(tr, mult) * mult, mult)
    bytes_per_row = LANES * max(p2.dtype.itemsize, q2.dtype.itemsize)
    tr_cap = max(mult, ((10 << 20) // bytes_per_row) // mult * mult)
    tr = min(tr, tr_cap)

    nblocks_p = pl.cdiv(rows_p, tr)
    nblocks_q = pl.cdiv(rows_q, tr)
    nblocks = max(nblocks_p, nblocks_q)
    core_split = min(core_split, nblocks)        # never leave a core fully idle
    tiles_per_core = pl.cdiv(nblocks, core_split)
    grid_rows = core_split * tiles_per_core * tr

    def in_spec(nblocks_x):
        last = nblocks_x - 1
        if core_split * tiles_per_core > nblocks_x:
            # Logical blocks past this input's end: clamp the DMA source to
            # the last real block; the kernel masks them to the log-neutral
            # value by absolute row index, so they contribute exactly zero.
            def index_map(c, i):
                return (jnp.minimum(c * tiles_per_core + i, last), 0)
        else:
            def index_map(c, i):
                return (c * tiles_per_core + i, 0)
        return pl.BlockSpec((tr, LANES), index_map)

    block_bytes = tr * LANES * (p2.dtype.itemsize + q2.dtype.itemsize)
    vmem_bytes = (2 * block_bytes                   # double-buffered inputs
                  + 2 * tr * LANES * 4              # possible f32 log temporaries
                  + 2 * SUBLANES * LANES * 4        # (8,128) accumulators
                  + 2 * 2 * SUBLANES * LANES * 4)   # double-buffered output
    vmem_limit = int(max(vmem_bytes + (4 << 20), 16 << 20))

    kernel = _make_kernel(tr, tiles_per_core, rows_p, rows_q, grid_rows)

    partials = pl.pallas_call(
        kernel,
        out_shape=jax.ShapeDtypeStruct((core_split, 2, SUBLANES, LANES),
                                       jnp.float32),
        grid_spec=pltpu.PrefetchScalarGridSpec(
            num_scalar_prefetch=0,
            grid=(core_split, tiles_per_core),
            in_specs=[in_spec(nblocks_p), in_spec(nblocks_q)],
            out_specs=pl.BlockSpec((1, 2, SUBLANES, LANES),
                                   lambda c, i: (c, 0, 0, 0)),
            scratch_shapes=[pltpu.VMEM((SUBLANES, LANES), jnp.float32),
                            pltpu.VMEM((SUBLANES, LANES), jnp.float32)],
        ),
        compiler_params=pltpu.CompilerParams(
            dimension_semantics=("parallel", "arbitrary"),
            vmem_limit_bytes=vmem_limit,
        ),
    )(p2, q2)

    sum_log_p = jnp.sum(partials[:, 0])
    sum_log_1mq = jnp.sum(partials[:, 1])
    return -(sum_log_p / n_p + sum_log_1mq / n_q)


if __name__ == "__main__":
    loss_fn = jax.jit(
        q1_4_loss,
        static_argnames=("tile_rows", "core_split", "min_pallas_elems"))

    key = jax.random.PRNGKey(0)
    kp, kq, kp2, kq2, kp3, kq3 = jax.random.split(key, 6)

    # 1) Module-typical NCHW discriminator probabilities (batch=2, ch=4, 16x16).
    #    Force the Pallas path (min_pallas_elems=0) so the kernel is exercised.
    p = jax.random.uniform(kp, (2, 4, 16, 16), minval=0.05, maxval=0.95,
                           dtype=jnp.float32)
    q = jax.random.uniform(kq, (2, 4, 16, 16), minval=0.05, maxval=0.95,
                           dtype=jnp.float32)
    loss = loss_fn(p, q, min_pallas_elems=0)
    jax.block_until_ready(loss)
    ref = -(jnp.mean(jnp.log(p)) + jnp.mean(jnp.log(1.0 - q)))
    assert jnp.allclose(loss, ref, rtol=1e-5, atol=1e-5), (loss, ref)

    # 2) Ragged size (not a multiple of 128) + tiny tiles: exercises the
    #    minimal tail pad, multi-step accumulation and edge-row masking.
    p_b = jax.random.uniform(kp2, (3, 5, 31, 33), minval=0.05, maxval=0.95,
                             dtype=jnp.float32)
    q_b = jax.random.uniform(kq2, (3, 5, 31, 33), minval=0.05, maxval=0.95,
                             dtype=jnp.float32)
    loss_b = loss_fn(p_b, q_b, tile_rows=16, min_pallas_elems=0)
    jax.block_until_ready(loss_b)
    ref_b = -(jnp.mean(jnp.log(p_b)) + jnp.mean(jnp.log(1.0 - q_b)))
    assert jnp.allclose(loss_b, ref_b, rtol=1e-4, atol=1e-4), (loss_b, ref_b)

    # 3) Mismatched p/q sizes: exercises the clamped index_map (logical blocks
    #    past the smaller input's end) plus per-input row masking.
    p_c = jax.random.uniform(kp3, (2, 2, 16, 16), minval=0.05, maxval=0.95,
                             dtype=jnp.float32)
    q_c = jax.random.uniform(kq3, (3, 5, 31, 33), minval=0.05, maxval=0.95,
                             dtype=jnp.float32)
    loss_c = loss_fn(p_c, q_c, tile_rows=8, min_pallas_elems=0)
    jax.block_until_ready(loss_c)
    ref_c = -(jnp.mean(jnp.log(p_c)) + jnp.mean(jnp.log(1.0 - q_c)))
    assert jnp.allclose(loss_c, ref_c, rtol=1e-4, atol=1e-4), (loss_c, ref_c)

    # 4) Default small-n bypass path (tiny inputs skip the Pallas launch).
    loss_d = loss_fn(p, q)
    jax.block_until_ready(loss_d)
    assert jnp.allclose(loss_d, ref, rtol=1e-5, atol=1e-5), (loss_d, ref)

    print("KERNEL_OK")
</pallas_src>

<mosaic_0001>
module attributes {stable_mosaic.version = 11 : i64} {
  func.func @kernel(%arg0: i32, %arg1: i32, %arg2: memref<16x128xf32, #tpu.memory_space<vmem>>, %arg3: memref<16x128xf32, #tpu.memory_space<vmem>>, %arg4: memref<1x2x8x128xf32, #tpu.memory_space<vmem>>, %arg5: memref<8x128xf32, #tpu.memory_space<vmem>>, %arg6: memref<8x128xf32, #tpu.memory_space<vmem>>) attributes {dimension_semantics = [#tpu.dimension_semantics<parallel>, #tpu.dimension_semantics<arbitrary>], iteration_bounds = array<i64: 1, 1>, scalar_prefetch = 0 : i64, scratch_operands = 2 : i64, tpu.core_type = #tpu.core_type<tc>, window_params = [{transform_indices = @transform_0, window_bounds = array<i64: 16, 128>}, {transform_indices = @transform_1, window_bounds = array<i64: 16, 128>}, {transform_indices = @transform_2, window_bounds = array<i64: 1, 2, 8, 128>}]} {
    %c0_i32 = arith.constant 0 : i32
    %0 = arith.cmpi eq, %arg1, %c0_i32 : i32
    %1 = arith.extui %0 : i1 to i32
    %c0_i32_0 = arith.constant 0 : i32
    %2 = arith.cmpi ne, %1, %c0_i32_0 : i32
    scf.if %2 {
      %cst_16 = arith.constant 0.000000e+00 : f32
      %22 = vector.broadcast %cst_16 : f32 to vector<8x128xf32>
      %c0_17 = arith.constant 0 : index
      %c0_18 = arith.constant 0 : index
      %23 = vector.load %arg5[%c0_17, %c0_18] : memref<8x128xf32, #tpu.memory_space<vmem>>, vector<8x128xf32>
      tpu.vector_store %arg5[%c0_17, %c0_18], %22 {strides = array<i32>} : memref<8x128xf32, #tpu.memory_space<vmem>>, vector<8x128xf32>,
      %cst_19 = arith.constant 0.000000e+00 : f32
      %24 = vector.broadcast %cst_19 : f32 to vector<8x128xf32>
      %c0_20 = arith.constant 0 : index
      %c0_21 = arith.constant 0 : index
      %25 = vector.load %arg6[%c0_20, %c0_21] : memref<8x128xf32, #tpu.memory_space<vmem>>, vector<8x128xf32>
      tpu.vector_store %arg6[%c0_20, %c0_21], %24 {strides = array<i32>} : memref<8x128xf32, #tpu.memory_space<vmem>>, vector<8x128xf32>,
    } else {
    }
    %c0 = arith.constant 0 : index
    %c0_1 = arith.constant 0 : index
    %3 = vector.load %arg2[%c0, %c0_1] : memref<16x128xf32, #tpu.memory_space<vmem>>, vector<16x128xf32>
    %c0_2 = arith.constant 0 : index
    %c0_3 = arith.constant 0 : index
    %4 = vector.load %arg3[%c0_2, %c0_3] : memref<16x128xf32, #tpu.memory_space<vmem>>, vector<16x128xf32>
    %c0_4 = arith.constant 0 : index
    %c0_5 = arith.constant 0 : index
    %5 = vector.load %arg5[%c0_4, %c0_5] : memref<8x128xf32, #tpu.memory_space<vmem>>, vector<8x128xf32>
    %6 = math.log %3 : vector<16x128xf32>
    %7 = vector.shape_cast %6 : vector<16x128xf32> to vector<2x8x128xf32>
    %cst = arith.constant dense<0.000000e+00> : vector<8x128xf32>
    %8 = vector.multi_reduction <add>, %7, %cst [0] : vector<2x8x128xf32> to vector<8x128xf32>
    %9 = arith.addf %5, %8 : vector<8x128xf32>
    %c0_6 = arith.constant 0 : index
    %c0_7 = arith.constant 0 : index
    %10 = vector.load %arg5[%c0_6, %c0_7] : memref<8x128xf32, #tpu.memory_space<vmem>>, vector<8x128xf32>
    tpu.vector_store %arg5[%c0_6, %c0_7], %9 {strides = array<i32>} : memref<8x128xf32, #tpu.memory_space<vmem>>, vector<8x128xf32>,
    %c0_8 = arith.constant 0 : index
    %c0_9 = arith.constant 0 : index
    %11 = vector.load %arg6[%c0_8, %c0_9] : memref<8x128xf32, #tpu.memory_space<vmem>>, vector<8x128xf32>
    %cst_10 = arith.constant 1.000000e+00 : f32
    %12 = vector.broadcast %cst_10 : f32 to vector<16x128xf32>
    %13 = arith.subf %12, %4 : vector<16x128xf32>
    %14 = math.log %13 : vector<16x128xf32>
    %15 = vector.shape_cast %14 : vector<16x128xf32> to vector<2x8x128xf32>
    %cst_11 = arith.constant dense<0.000000e+00> : vector<8x128xf32>
    %16 = vector.multi_reduction <add>, %15, %cst_11 [0] : vector<2x8x128xf32> to vector<8x128xf32>
    %17 = arith.addf %11, %16 : vector<8x128xf32>
    %c0_12 = arith.constant 0 : index
    %c0_13 = arith.constant 0 : index
    %18 = vector.load %arg6[%c0_12, %c0_13] : memref<8x128xf32, #tpu.memory_space<vmem>>, vector<8x128xf32>
    tpu.vector_store %arg6[%c0_12, %c0_13], %17 {strides = array<i32>} : memref<8x128xf32, #tpu.memory_space<vmem>>, vector<8x128xf32>,
    %c0_i32_14 = arith.constant 0 : i32
    %19 = arith.cmpi eq, %arg1, %c0_i32_14 : i32
    %20 = arith.extui %19 : i1 to i32
    %c0_i32_15 = arith.constant 0 : i32
    %21 = arith.cmpi ne, %20, %c0_i32_15 : i32
    scf.if %21 {
      %c0_16 = arith.constant 0 : index
      %c0_17 = arith.constant 0 : index
      %22 = vector.load %arg5[%c0_16, %c0_17] : memref<8x128xf32, #tpu.memory_space<vmem>>, vector<8x128xf32>
      %c0_18 = arith.constant 0 : index
      %c0_19 = arith.constant 0 : index
      %c0_20 = arith.constant 0 : index
      %c0_21 = arith.constant 0 : index
      %23 = vector.load %arg4[%c0_18, %c0_19, %c0_20, %c0_21] : memref<1x2x8x128xf32, #tpu.memory_space<vmem>>, vector<1x1x8x128xf32>
      %24 = vector.shape_cast %23 : vector<1x1x8x128xf32> to vector<8x128xf32>
      %25 = vector.shape_cast %22 : vector<8x128xf32> to vector<1x1x8x128xf32>
      tpu.vector_store %arg4[%c0_18, %c0_19, %c0_20, %c0_21], %25 {strides = array<i32>} : memref<1x2x8x128xf32, #tpu.memory_space<vmem>>, vector<1x1x8x128xf32>,
      %c0_22 = arith.constant 0 : index
      %c0_23 = arith.constant 0 : index
      %26 = vector.load %arg6[%c0_22, %c0_23] : memref<8x128xf32, #tpu.memory_space<vmem>>, vector<8x128xf32>
      %c0_24 = arith.constant 0 : index
      %c1 = arith.constant 1 : index
      %c0_25 = arith.constant 0 : index
      %c0_26 = arith.constant 0 : index
      %27 = vector.load %arg4[%c0_24, %c1, %c0_25, %c0_26] : memref<1x2x8x128xf32, #tpu.memory_space<vmem>>, vector<1x1x8x128xf32>
      %28 = vector.shape_cast %27 : vector<1x1x8x128xf32> to vector<8x128xf32>
      %29 = vector.shape_cast %26 : vector<8x128xf32> to vector<1x1x8x128xf32>
      tpu.vector_store %arg4[%c0_24, %c1, %c0_25, %c0_26], %29 {strides = array<i32>} : memref<1x2x8x128xf32, #tpu.memory_space<vmem>>, vector<1x1x8x128xf32>,
    } else {
    }
    return
  }
  func.func @transform_0(%arg0: i32, %arg1: i32) -> (i32, i32) {
    %c1_i32 = arith.constant 1 : i32
    %0 = arith.muli %arg0, %c1_i32 : i32
    %1 = arith.addi %0, %arg1 : i32
    %c0_i32 = arith.constant 0 : i32
    %c0_i32_0 = arith.constant 0 : i32
    return %1, %c0_i32 : i32, i32
  }
  func.func @transform_1(%arg0: i32, %arg1: i32) -> (i32, i32) {
    %c1_i32 = arith.constant 1 : i32
    %0 = arith.muli %arg0, %c1_i32 : i32
    %1 = arith.addi %0, %arg1 : i32
    %c0_i32 = arith.constant 0 : i32
    %c0_i32_0 = arith.constant 0 : i32
    return %1, %c0_i32 : i32, i32
  }
  func.func @transform_2(%arg0: i32, %arg1: i32) -> (i32, i32, i32, i32) {
    %c0_i32 = arith.constant 0 : i32
    %c0_i32_0 = arith.constant 0 : i32
    %c0_i32_1 = arith.constant 0 : i32
    %c0_i32_2 = arith.constant 0 : i32
    return %arg0, %c0_i32, %c0_i32_0, %c0_i32_1 : i32, i32, i32, i32
  }
}

</mosaic_0001>

<bundles_post_ra>
// kernel: q1_4_loss.1
= control target key start
LH: loop header
LB: loop body
LE: loop exit
PB: predicated region body
PF: predicated region fallthrough
CT: control target
= control target key end

     0   :  { %s149_s0 = inlined_call_operand.vmem [shape: f32[16,128], index: 0, kind: input, shape index: {}]   ;;  %s150_s1 = inlined_call_operand.vmem [shape: f32[16,128], index: 1, kind: input, shape index: {}]   ;;  %s151_s2 = inlined_call_operand.vmem [shape: f32[1,2,8,128], index: 2, kind: output, shape index: {}]  }
   0x1   :  { %v61_v0 = vld [vmem:[%s149_s0] sm:$0xff]  ;;  %v62_v1 = vld [vmem:[%s149_s0 + $0x8] sm:$0xff] }
   0x2   :  { %v63_v2 = vld [vmem:[%s150_s1] sm:$0xff]  ;;  %108 = vlog2.f32 %v61_v0  ;;  %v64_v3 = vld [vmem:[%s150_s1 + $0x8] sm:$0xff] }
   0x3   :  { %v74_v4 = vsub.f32 1.0, %v63_v2  ;;  %110 = vlog2.f32 %v62_v1  ;;  %v75_v5 = vsub.f32 1.0, %v64_v3 }
   0x5   :  { %112 = vlog2.f32 %v74_v4 }
   0x6   :  { %114 = vlog2.f32 %v75_v5 }
   0xc   :  { %v109_v6 = vpop.eup %108 }
   0xd   :  { %v111_v7 = vpop.eup %110  ;;  %v67_v8 = vmul.f32 0.6931472, %v109_v6 }
   0xe   :  { %v69_v10 = vmul.f32 0.6931472, %v111_v7 }
   0xf   :  { %v113_v9 = vpop.eup %112 }
  0x10   :  { %v115_v11 = vpop.eup %114  ;;  %v77_v12 = vmul.f32 0.6931472, %v113_v9  ;;  %v70_v13 = vadd.f32 %v69_v10, %v67_v8 }
  0x11   :  { %v79_v14 = vmul.f32 0.6931472, %v115_v11 }
  0x12   :  { %87 = vst [vmem:[%s151_s2] sm:$0xff] %v70_v13 }
  0x13   :  { %v80_v15 = vadd.f32 %v79_v14, %v77_v12 }
  0x15   :  { %107 = vst [vmem:[%s151_s2 + $0x8] sm:$0xff] %v80_v15 }

</bundles_post_ra>
